<compile_context>
chip_gen: v6e
topology: v6e:2x2x1
jax: 0.10.0
libtpu: 0.0.40
codegen_flags: <defaults>
</compile_context>

<pallas_src>
import jax
import jax.numpy as jnp
from jax.experimental import pallas as pl
from jax.experimental.pallas import tpu as pltpu

IN_FEATURES = 32 * 32 * 3   # 3072
OUT_FEATURES = 10
N_PAD = 128                 # lane-dense padded output width (keep at 128)
TM_MAX = 1024               # max batch-tile rows (VMEM-safe on v5e/v6e/v7x)


def _round_up(x, m):
    return (x + m - 1) // m * m


def _choose_tm(B):
    """Batch-tile rows.

    - Tiny batch (<= 8): one block covering the whole batch (block dims equal
      the full array dims, so no sublane-divisibility issue).
    - Otherwise: aim for >= 2 grid steps so the "parallel" batch axis can be
      sharded across both v7x TensorCores, cap the tile at TM_MAX for VMEM
      headroom, round to a multiple of 8 sublanes.
    """
    if B <= 8:
        return B
    n_tiles = max(2, pl.cdiv(B, TM_MAX))
    return min(TM_MAX, _round_up(pl.cdiv(B, n_tiles), 8))


def _linear_kernel(x_ref, w_ref, b_ref, o_ref):
    # One (tm, 3072) x (3072, 128) matmul per grid step; weight / bias have a
    # constant index_map so they are DMA'd once and stay VMEM-resident — only
    # x streams from HBM.  Accumulate in f32 regardless of input dtype.
    acc = jnp.dot(x_ref[...], w_ref[...], preferred_element_type=jnp.float32)
    o_ref[...] = (acc + b_ref[...].astype(jnp.float32)).astype(o_ref.dtype)


def pad_params(weight, bias):
    """Pre-pad nn.Linear params to the lane-dense kernel layout.

    Call ONCE at init (not per forward call): (10, 3072) -> (3072, 128) and
    (10,) -> (1, 128), zero-filled beyond column 10.
    """
    w_pad = (
        jnp.zeros((IN_FEATURES, N_PAD), weight.dtype)
        .at[:, :OUT_FEATURES].set(weight.T)
    )
    b_pad = (
        jnp.zeros((1, N_PAD), bias.dtype)
        .at[:, :OUT_FEATURES].set(bias)
    )
    return w_pad, b_pad


@jax.jit
def linear_net_forward(x_nchw, w_pad, b_pad):
    """Forward pass of LinearNet.

    Args:
      x_nchw: (B, 3, 32, 32) float32 (bf16 also supported if stored that way)
      w_pad:  (3072, 128) pre-padded weight from pad_params()
      b_pad:  (1, 128)    pre-padded bias   from pad_params()
    Returns:
      (B, 10) array in x's dtype.
    """
    B = x_nchw.shape[0]
    x_flat = x_nchw.reshape(B, IN_FEATURES)   # same as torch .view(-1, 3072)

    tm = _choose_tm(B)
    grid = (pl.cdiv(B, tm),)                  # ragged last tile handled by the pipeline

    itemsize = jnp.dtype(x_flat.dtype).itemsize
    cost = pl.CostEstimate(
        flops=2 * B * IN_FEATURES * OUT_FEATURES,        # true flops, not padded
        transcendentals=0,
        bytes_accessed=(
            B * IN_FEATURES * itemsize                   # x streamed from HBM
            + IN_FEATURES * N_PAD * jnp.dtype(w_pad.dtype).itemsize   # weight (read once)
            + B * N_PAD * itemsize                       # output writeback
        ),
    )

    out = pl.pallas_call(
        _linear_kernel,
        out_shape=jax.ShapeDtypeStruct((B, N_PAD), x_flat.dtype),
        grid_spec=pltpu.PrefetchScalarGridSpec(
            num_scalar_prefetch=0,
            grid=grid,
            in_specs=[
                pl.BlockSpec((tm, IN_FEATURES), lambda i: (i, 0)),
                # Constant block index -> Mosaic fetches these once and keeps
                # them resident; no re-DMA per grid step.
                pl.BlockSpec((IN_FEATURES, N_PAD), lambda i: (0, 0)),
                pl.BlockSpec((1, N_PAD), lambda i: (0, 0)),
            ],
            out_specs=pl.BlockSpec((tm, N_PAD), lambda i: (i, 0)),
        ),
        compiler_params=pltpu.CompilerParams(
            dimension_semantics=("parallel",),   # batch tiles are independent
            vmem_limit_bytes=48 << 20,           # < v7x 64 MiB phys, > v5e/v6e defaults
        ),
        cost_estimate=cost,
    )(x_flat, w_pad, b_pad)

    # Drop the zero-padded output columns (rows are already exactly B).
    return out[:, :OUT_FEATURES]


def init_params(key):
    """Deterministic init matching nn.Linear's default (uniform +/- 1/sqrt(fan_in))."""
    kw, kb = jax.random.split(key)
    bound = 1.0 / jnp.sqrt(jnp.float32(IN_FEATURES))
    weight = jax.random.uniform(
        kw, (OUT_FEATURES, IN_FEATURES), jnp.float32, -bound, bound)
    bias = jax.random.uniform(
        kb, (OUT_FEATURES,), jnp.float32, -bound, bound)
    return weight, bias


if __name__ == "__main__":
    key = jax.random.PRNGKey(0)
    k_x, k_p = jax.random.split(key)

    # B=16 exercises the multi-tile path (tm=8, grid=(2,)) at a small shape.
    B = 16
    x = jax.random.normal(k_x, (B, 3, 32, 32), jnp.float32)
    weight, bias = init_params(k_p)
    w_pad, b_pad = pad_params(weight, bias)   # padded once, outside the forward path

    out = linear_net_forward(x, w_pad, b_pad)
    out = jax.block_until_ready(out)

    # Sanity check against plain-JAX reference.
    ref = x.reshape(B, IN_FEATURES) @ weight.T + bias
    assert out.shape == (B, OUT_FEATURES)
    assert jnp.allclose(out, ref, atol=1e-4, rtol=1e-4)

    print("KERNEL_OK")
</pallas_src>

<mosaic_0001>
module attributes {stable_mosaic.version = 11 : i64} {
  func.func @_linear_kernel(%arg0: i32, %arg1: memref<8x3072xf32, #tpu.memory_space<vmem>>, %arg2: memref<3072x128xf32, #tpu.memory_space<vmem>>, %arg3: memref<1x128xf32, #tpu.memory_space<vmem>>, %arg4: memref<8x128xf32, #tpu.memory_space<vmem>>) attributes {dimension_semantics = [#tpu.dimension_semantics<parallel>], iteration_bounds = array<i64: 2>, scalar_prefetch = 0 : i64, scratch_operands = 0 : i64, tpu.core_type = #tpu.core_type<tc>, window_params = [{transform_indices = @transform_0, window_bounds = array<i64: 8, 3072>}, {pipeline_mode = #tpu.pipeline_mode<synchronous>, transform_indices = @transform_1, window_bounds = array<i64: 3072, 128>}, {pipeline_mode = #tpu.pipeline_mode<synchronous>, transform_indices = @transform_2, window_bounds = array<i64: 1, 128>}, {transform_indices = @transform_3, window_bounds = array<i64: 8, 128>}]} {
    %c0 = arith.constant 0 : index
    %c0_0 = arith.constant 0 : index
    %0 = vector.load %arg1[%c0, %c0_0] : memref<8x3072xf32, #tpu.memory_space<vmem>>, vector<8x3072xf32>
    %c0_1 = arith.constant 0 : index
    %c0_2 = arith.constant 0 : index
    %1 = vector.load %arg2[%c0_1, %c0_2] : memref<3072x128xf32, #tpu.memory_space<vmem>>, vector<3072x128xf32>
    %cst = arith.constant dense<0.000000e+00> : vector<8x128xf32>
    %2 = tpu.matmul %0, %1, %cst {dimension_numbers = #tpu.dot_dimension_numbers<[1], [0], [0], [1], [0, 0, 1, 1], [], []>} : vector<8x3072xf32>, vector<3072x128xf32>, vector<8x128xf32> -> vector<8x128xf32>
    %c0_3 = arith.constant 0 : index
    %c0_4 = arith.constant 0 : index
    %3 = vector.load %arg3[%c0_3, %c0_4] : memref<1x128xf32, #tpu.memory_space<vmem>>, vector<1x128xf32>
    %4 = vector.broadcast %3 : vector<1x128xf32> to vector<8x128xf32>
    %5 = arith.addf %2, %4 : vector<8x128xf32>
    %c0_5 = arith.constant 0 : index
    %c0_6 = arith.constant 0 : index
    %6 = vector.load %arg4[%c0_5, %c0_6] : memref<8x128xf32, #tpu.memory_space<vmem>>, vector<8x128xf32>
    tpu.vector_store %arg4[%c0_5, %c0_6], %5 {strides = array<i32>} : memref<8x128xf32, #tpu.memory_space<vmem>>, vector<8x128xf32>,
    return
  }
  func.func @transform_0(%arg0: i32) -> (i32, i32) {
    %c0_i32 = arith.constant 0 : i32
    %c0_i32_0 = arith.constant 0 : i32
    return %arg0, %c0_i32 : i32, i32
  }
  func.func @transform_1(%arg0: i32) -> (i32, i32) {
    %c0_i32 = arith.constant 0 : i32
    %c0_i32_0 = arith.constant 0 : i32
    %c0_i32_1 = arith.constant 0 : i32
    return %c0_i32, %c0_i32_0 : i32, i32
  }
  func.func @transform_2(%arg0: i32) -> (i32, i32) {
    %c0_i32 = arith.constant 0 : i32
    %c0_i32_0 = arith.constant 0 : i32
    %c0_i32_1 = arith.constant 0 : i32
    return %c0_i32, %c0_i32_0 : i32, i32
  }
  func.func @transform_3(%arg0: i32) -> (i32, i32) {
    %c0_i32 = arith.constant 0 : i32
    %c0_i32_0 = arith.constant 0 : i32
    return %arg0, %c0_i32 : i32, i32
  }
}

</mosaic_0001>

<bundles_post_ra>
// kernel: linear_net_forward.1
= control target key start
LH: loop header
LB: loop body
LE: loop exit
PB: predicated region body
PF: predicated region fallthrough
CT: control target
= control target key end

     0   :  { %8 = vsyncpa [#allocation3], 0  ;;  %s2352_s0 = inlined_call_operand.vmem [shape: f32[16,3072], index: 0, kind: input, shape index: {}]   ;;  %s2353_s1 = inlined_call_operand.hbm [shape: f32[3072,128], index: 1, kind: input, shape index: {}]   ;;  %s2354_s2 = inlined_call_operand.hbm [shape: f32[1,128], index: 2, kind: input, shape index: {}]   ;;  %s2355_s3 = inlined_call_operand.hbm [shape: f32[16,128], index: 3, kind: output, shape index: {}]  }
   0x1   :  { %9 = vsyncpa [#allocation6], 0 }
   0x2   :  { %10 = vsyncpa [#allocation4], 0 }
   0x3   :  { %12 = vsyncpa [#allocation4 + $0x1], 0  ;;  %s2193_s12 = smov 0   ;;  %s2195_s13 = smov 0  }
   0x4   :  { %s2197_s14 = smov 0   ;;  %s2199_s15 = smov 0  }
   0x5 LB: > { %s2214_s16 = sadd.s32 4294967295, %s2166_s15   ;;  %s1548_s17 = sadd.s32 4294967294, %s2166_s15   ;;  %s2166_s15 = sphi %s2199_s15, %s2368_s15   ;;  %s2162_s14 = sphi %s2197_s14, %s2367_s14   ;;  %s2158_s13 = sphi %s2195_s13, %s2366_s13   ;;  %s2154_s12 = sphi %s2193_s12, %s2365_s12  }
   0x6   : > { %s2218_s18 = sadd.s32 1, %s2166_s15   ;;  %s93_s19 = sadd.s32 1, %s2162_s14 }
   0x7   : > { %s90_s20 = ssub.s32 %s2166_s15, %s2218_s18  ;;  %p103_p0 = scmp.ne.s32.totalorder %s2162_s14, %s2158_s13 }
   0x8   : > { %p91_p1 = scmp.eq.s32.totalorder %s90_s20, 0  ;;  %p104_p2 = scmp.eq.s32.totalorder %s2214_s16, 1 }
   0x9   : > { %p109_p3 = scmp.ne.s32.totalorder %s2158_s13, %s2154_s12  ;;  %p110_p4 = scmp.eq.s32.totalorder %s1548_s17, 1 }
   0xa   : > { %s2229_s21 = scalar_select %p91_p1, %s2162_s14, %s93_s19  }
   0xb   : > { %p2231_p5 = por %p104_p2, %p103_p0  ;;  %p2235_p6 = por %p110_p4, %p109_p3 }
   0xc   : > { %p1549_p7 = scmp.ge.s32.totalorder %s2166_s15, 1  ;;  %p117_p8 = scmp.lt.s32.totalorder %s2166_s15, 3 }
   0xd   : > { %p2356_p9 = scmp.eq.s32.totalorder %s2214_s16, 0  ;;  %s2168_s25 = smov [#allocation2]  }
   0xe   : > { %p2242_p10 = pnand %p1549_p7, %p117_p8  ;;  %s129_s26 = sshll.u32 %s2168_s25, 4  ;;  %s130_s26 = int_to_ptr.vmem [resolvable:$true] %s129_s26 }
   0xf   : > { %s2169_s28 = smov [#allocation5]   ;;  %s2057_s30 = scalar_lea.vmem %s130_s26, 49152 }
  0x10   : > { %p1994_p11 = pneg %p2242_p10  ;;  %s143_s29 = sshll.u32 %s2169_s28, 4  ;;  %s144_s29 = int_to_ptr.vmem [resolvable:$true] %s143_s29 }
  0x11   : > { %p2058_p0 = scmp.ne.s32.totalorder %s130_s26, %s2057_s30  ;;  %p2065_p3 = scmp.lt.s32.totalorder %s130_s26, %s130_s26 }
  0x12   : > { %p2250_p12 = pnand %p2356_p9, %p1994_p11  ;;  %p2066_p4 = scmp.lt.s32.totalorder %s2057_s30, %s2057_s30 }
  0x14   : > { %p2048_p13 = pneg %p2250_p12  ;;  %p2067_p7 = por %p2066_p4, %p2065_p3 }
  0x16   : > { %p2060_p1 = pnand %p2058_p0, %p2048_p13 }
  0x18   : > { %p2061_p2 = pneg %p2060_p1 }
  0x1a   : > { %p2068_p8 = pnand %p2067_p7, %p2061_p2 }
  0x1c   : > { %2071 = shalt.err (!%p2068_p8)
}
  0x1d   : > { %s2170_s4 = smov 128   ;;  %s2171_s5 = smov 8  }
  0x1e   : > { %1997 = dma.hbm_to_vmem [thread:$0]  (!%p2250_p12), %s2353_s1, 49152, %s130_s26, [#allocation3], %s2170_s4, %s2170_s4, %s2171_s5  }
  0x1f   : > { %s2083_s8 = scalar_lea.vmem %s144_s29, 16  ;;  %s2090_s9 = scalar_lea.vmem %s144_s29, 32 }
  0x20   : > { %p2084_p11 = scmp.ne.s32.totalorder %s144_s29, %s2083_s8  ;;  %p2091_p9 = scmp.lt.s32.totalorder %s144_s29, %s144_s29 }
  0x21   : > { %p2092_p3 = scmp.lt.s32.totalorder %s2090_s9, %s2083_s8 }
  0x22   : > { %p2086_p0 = pnand %p2084_p11, %p2048_p13 }
  0x23   : > { %p2093_p2 = por %p2092_p3, %p2091_p9 }
  0x24   : > { %p2087_p1 = pneg %p2086_p0 }
  0x26   : > { %p2094_p4 = pnand %p2093_p2, %p2087_p1 }
  0x28   : > { %2097 = shalt.err (!%p2094_p4)
}
  0x29   : > { %2000 = dma.hbm_to_vmem [thread:$0]  (!%p2250_p12), %s2354_s2, 16, %s144_s29, [#allocation6]  }
  0x2a   : > { %164 = sbr.rel (%p2242_p10) target bundleno = 470 (0x1d6), region = 32  ;;  %p2361_p7 = scmp.eq.s32.totalorder (!%p2242_p10), %s2214_s16, 0 }
  0x2f   : > { %2141 = dma.done.wait (%p2361_p7), [#allocation3], 49152   ;;  %p2362_p13 = pmov %p2361_p7 }
  0x30   : > { %p2363_p8 = pmov %p2361_p7 }
  0x31   : > { %2143 = vsyncadd (%p2362_p13), [#allocation3], 4294918144 }
  0x32   : > { %2145 = dma.done.wait (%p2363_p8), [#allocation6], 16   ;;  %p2364_p9 = pmov %p2361_p7 }
  0x33   : > { %v252_v0 = vld [vmem:[#allocation2 + $0xf8] sm:$0xff]  ;;  %v251_v4 = vld [vmem:[#allocation2 + $0xf0] sm:$0xff]  ;;  %v250_v8 = vld [vmem:[#allocation2 + $0xe8] sm:$0xff]  ;;  %p192_p10 = scmp.lt.s32.totalorder %s2214_s16, 1  ;;  %s189_s26 = sand.u32 1, %s2158_s13  }
  0x34   : > { %2147 = vsyncadd (%p2364_p9), [#allocation6], 4294967280  ;;  %v284_v1 = vld [vmem:[#allocation2 + $0x1f8] sm:$0xff]  ;;  %1563 = vmatprep.subr.mxu0 %v252_v0  ;;  %v283_v5 = vld [vmem:[#allocation2 + $0x1f0] sm:$0xff]  ;;  %s1556_s27 = sshll.u32 %s189_s26, 3  ;;  %s1560_s28 = sshll.u32 %s2214_s16, 7 }
  0x35   : > { %v236_v2 = vld [vmem:[#allocation2 + $0x78] sm:$0xff]  ;;  %1598 = vmatprep.subr.mxu1 %v284_v1  ;;  %v235_v6 = vld [vmem:[#allocation2 + $0x70] sm:$0xff]  ;;  %v282_v9 = vld [vmem:[#allocation2 + $0x1e8] sm:$0xff]  ;;  %s2286_s17 = scalar_select %p192_p10, %s2214_s16, 1 }
  0x36   : > { %v268_v3 = vld [vmem:[#allocation2 + $0x178] sm:$0xff]  ;;  %1564 = vmatpush3.msra.mxu0 %v236_v2  ;;  %v267_v7 = vld [vmem:[#allocation2 + $0x170] sm:$0xff]  ;;  %v234_v10 = vld [vmem:[#allocation2 + $0x68] sm:$0xff]  ;;  %s191_s29 = scalar_lea.vmem [#allocation7], %s1556_s27  ;;  %s1465_s6 = scalar_lea.hbm %s2355_s3, %s1560_s28 }
  0x37   : > { %1599 = vmatpush3.msra.mxu1 %v268_v3  ;;  %1565 = vmatprep.subr.mxu0 %v251_v4  ;;  %v266_v11 = vld [vmem:[#allocation2 + $0x168] sm:$0xff]  ;;  %v249_v12 = vld [vmem:[#allocation2 + $0xe0] sm:$0xff]  ;;  %v248_v16 = vld [vmem:[#allocation2 + $0xd8] sm:$0xff]  ;;  %s1983_s19 = smul.u32 192, %s2286_s17  ;;  %s1467_s30 = sshll.u32 %s191_s29, 4  ;;  %s1468_s30 = int_to_ptr.vmem [resolvable:$true] %s1467_s30 }
  0x38   : > { %1600 = vmatprep.subr.mxu1 %v283_v5  ;;  %1566 = vmatpush3.msra.mxu0 %v235_v6  ;;  %v281_v13 = vld [vmem:[#allocation2 + $0x1e0] sm:$0xff]  ;;  %v280_v17 = vld [vmem:[#allocation2 + $0x1d8] sm:$0xff]  ;;  %v247_v20 = vld [vmem:[#allocation2 + $0xd0] sm:$0xff]  ;;  %s1454_s7 = scalar_lea.sflag [#allocation4], %s189_s26  ;;  %s2098_s8 = scalar_lea.vmem %s1468_s30, 128 }
  0x39   : > { %1601 = vmatpush3.msra.mxu1 %v267_v7  ;;  %1567 = vmatprep.subr.mxu0 %v250_v8  ;;  %v233_v14 = vld [vmem:[#allocation2 + $0x60] sm:$0xff]  ;;  %v232_v18 = vld [vmem:[#allocation2 + $0x58] sm:$0xff]  ;;  %v279_v21 = vld [vmem:[#allocation2 + $0x1d0] sm:$0xff]  ;;  %s2292_s25 = scalar_lea.vmem %s2352_s0, %s1983_s19  ;;  %p2099_p12 = scmp.ne.s32.totalorder %s1468_s30, %s2098_s8 }
  0x3a   : > { %1602 = vmatprep.subr.mxu1 %v282_v9  ;;  %v265_v15 = vld [vmem:[#allocation2 + $0x160] sm:$0xff]  ;;  %1568 = vmatpush3.msra.mxu0 %v234_v10  ;;  %v264_v19 = vld [vmem:[#allocation2 + $0x158] sm:$0xff]  ;;  %v231_v22 = vld [vmem:[#allocation2 + $0x50] sm:$0xff]  ;;  %s2172_s9 = smov [#allocation7]  }
  0x3b   : > { %1603 = vmatpush3.msra.mxu1 %v266_v11  ;;  %1569 = vmatprep.subr.mxu0 %v249_v12  ;;  %v263_v23 = vld [vmem:[#allocation2 + $0x150] sm:$0xff]  ;;  %v246_v24 = vld [vmem:[#allocation2 + $0xc8] sm:$0xff]  ;;  %v245_v28 = vld [vmem:[#allocation2 + $0xc0] sm:$0xff]  ;;  %p2100_p11 = pnand %p2099_p12, %p2231_p5  ;;  %s2102_s10 = sshll.u32 %s2172_s9, 4  ;;  %s2103_s10 = int_to_ptr.vmem [resolvable:$false] %s2102_s10 }
  0x3c   : > { %1604 = vmatprep.subr.mxu1 %v281_v13  ;;  %1570 = vmatpush3.msra.mxu0 %v233_v14  ;;  %v278_v25 = vld [vmem:[#allocation2 + $0x1c8] sm:$0xff]  ;;  %v277_v29 = vld [vmem:[#allocation2 + $0x1c0] sm:$0xff]  ;;  %v244_v32 = vld [vmem:[#allocation2 + $0xb8] sm:$0xff]  ;;  %s2104_s16 = scalar_lea.vmem %s2103_s10, 256  ;;  %p2105_p1 = scmp.lt.s32.totalorder %s1468_s30, %s2103_s10 }
  0x3d   : > { %1605 = vmatpush3.msra.mxu1 %v265_v15  ;;  %1571 = vmatprep.subr.mxu0 %v248_v16  ;;  %v230_v26 = vld [vmem:[#allocation2 + $0x48] sm:$0xff]  ;;  %v229_v30 = vld [vmem:[#allocation2 + $0x40] sm:$0xff]  ;;  %v276_v33 = vld [vmem:[#allocation2 + $0x1b8] sm:$0xff]  ;;  %p2101_p0 = pneg %p2100_p11  ;;  %p2106_p3 = scmp.lt.s32.totalorder %s2104_s16, %s2098_s8 }
  0x3e   : > { %1606 = vmatprep.subr.mxu1 %v280_v17  ;;  %1572 = vmatpush3.msra.mxu0 %v232_v18  ;;  %v262_v27 = vld [vmem:[#allocation2 + $0x148] sm:$0xff]  ;;  %v261_v31 = vld [vmem:[#allocation2 + $0x140] sm:$0xff]  ;;  %v228_v34 = vld [vmem:[#allocation2 + $0x38] sm:$0xff] }
  0x3f   : > { %1607 = vmatpush3.msra.mxu1 %v264_v19  ;;  %1573 = vmatprep.subr.mxu0 %v247_v20  ;;  %v260_v35 = vld [vmem:[#allocation2 + $0x138] sm:$0xff]  ;;  %v243_v36 = vld [vmem:[#allocation2 + $0xb0] sm:$0xff]  ;;  %v242_v40 = vld [vmem:[#allocation2 + $0xa8] sm:$0xff]  ;;  %p2107_p2 = por %p2106_p3, %p2105_p1 }
  0x40   : > { %1608 = vmatprep.subr.mxu1 %v279_v21  ;;  %1574 = vmatpush3.msra.mxu0 %v231_v22  ;;  %v275_v37 = vld [vmem:[#allocation2 + $0x1b0] sm:$0xff]  ;;  %v274_v41 = vld [vmem:[#allocation2 + $0x1a8] sm:$0xff]  ;;  %v241_v44 = vld [vmem:[#allocation2 + $0xa0] sm:$0xff] }
  0x41   : > { %1609 = vmatpush3.msra.mxu1 %v263_v23  ;;  %1575 = vmatprep.subr.mxu0 %v246_v24  ;;  %v227_v38 = vld [vmem:[#allocation2 + $0x30] sm:$0xff]  ;;  %v226_v42 = vld [vmem:[#allocation2 + $0x28] sm:$0xff]  ;;  %v273_v45 = vld [vmem:[#allocation2 + $0x1a0] sm:$0xff]  ;;  %p2108_p4 = pnand %p2107_p2, %p2101_p0 }
  0x42   : > { %1610 = vmatprep.subr.mxu1 %v278_v25  ;;  %1576 = vmatpush3.msra.mxu0 %v230_v26  ;;  %v259_v39 = vld [vmem:[#allocation2 + $0x130] sm:$0xff]  ;;  %v258_v43 = vld [vmem:[#allocation2 + $0x128] sm:$0xff]  ;;  %v225_v46 = vld [vmem:[#allocation2 + $0x20] sm:$0xff] }
  0x43   : > { %1611 = vmatpush3.msra.mxu1 %v262_v27  ;;  %1577 = vmatprep.subr.mxu0 %v245_v28  ;;  %v257_v47 = vld [vmem:[#allocation2 + $0x120] sm:$0xff]  ;;  %v240_v48 = vld [vmem:[#allocation2 + $0x98] sm:$0xff]  ;;  %v239_v52 = vld [vmem:[#allocation2 + $0x90] sm:$0xff] }
  0x44   : > { %1612 = vmatprep.subr.mxu1 %v277_v29  ;;  %1578 = vmatpush3.msra.mxu0 %v229_v30  ;;  %v272_v49 = vld [vmem:[#allocation2 + $0x198] sm:$0xff]  ;;  %v271_v53 = vld [vmem:[#allocation2 + $0x190] sm:$0xff]  ;;  %v238_v56 = vld [vmem:[#allocation2 + $0x88] sm:$0xff] }
  0x45   : > { %1613 = vmatpush3.msra.mxu1 %v261_v31  ;;  %1579 = vmatprep.subr.mxu0 %v244_v32  ;;  %v224_v50 = vld [vmem:[#allocation2 + $0x18] sm:$0xff]  ;;  %v223_v54 = vld [vmem:[#allocation2 + $0x10] sm:$0xff]  ;;  %v270_v57 = vld [vmem:[#allocation2 + $0x188] sm:$0xff] }
  0x46   : > { %1614 = vmatprep.subr.mxu1 %v276_v33  ;;  %1580 = vmatpush3.msra.mxu0 %v228_v34  ;;  %v256_v51 = vld [vmem:[#allocation2 + $0x118] sm:$0xff]  ;;  %v255_v55 = vld [vmem:[#allocation2 + $0x110] sm:$0xff]  ;;  %v222_v58 = vld [vmem:[#allocation2 + $0x8] sm:$0xff] }
  0x47   : > { %1615 = vmatpush3.msra.mxu1 %v260_v35  ;;  %1581 = vmatprep.subr.mxu0 %v243_v36  ;;  %v254_v59 = vld [vmem:[#allocation2 + $0x108] sm:$0xff]  ;;  %v237_v60 = vld [vmem:[#allocation2 + $0x80] sm:$0xff]  ;;  %v200_v2 = vld [vmem:[%s2292_s25 + $0x18] sm:$0xff] }
  0x48   : > { %1616 = vmatprep.subr.mxu1 %v275_v37  ;;  %1582 = vmatpush3.msra.mxu0 %v227_v38  ;;  %v269_v61 = vld [vmem:[#allocation2 + $0x180] sm:$0xff]  ;;  %v198_v63 = vld [vmem:[%s2292_s25 + $0x8] sm:$0xff]  ;;  %v316_v3 = vld [vmem:[#allocation2 + $0x2f8] sm:$0xff] }
  0x49   : > { %1617 = vmatpush3.msra.mxu1 %v259_v39  ;;  %1583 = vmatprep.subr.mxu0 %v242_v40  ;;  %v221_v62 = vld [vmem:[#allocation2] sm:$0xff]  ;;  %v348_v4 = vld [vmem:[#allocation2 + $0x3f8] sm:$0xff]  ;;  %v199_v5 = vld [vmem:[%s2292_s25 + $0x10] sm:$0xff] }
  0x4a   : > { %1618 = vmatprep.subr.mxu1 %v274_v41  ;;  %1584 = vmatpush3.msra.mxu0 %v226_v42  ;;  %v253_v0 = vld [vmem:[#allocation2 + $0x100] sm:$0xff]  ;;  %v300_v6 = vld [vmem:[#allocation2 + $0x278] sm:$0xff]  ;;  %v315_v8 = vld [vmem:[#allocation2 + $0x2f0] sm:$0xff] }
  0x4b   : > { %1619 = vmatpush3.msra.mxu1 %v258_v43  ;;  %1585 = vmatprep.subr.mxu0 %v241_v44  ;;  %v197_v1 = vld [vmem:[%s2292_s25] sm:$0xff]  ;;  %v332_v7 = vld [vmem:[#allocation2 + $0x378] sm:$0xff]  ;;  %v347_v9 = vld [vmem:[#allocation2 + $0x3f0] sm:$0xff] }
  0x4c   : > { %1620 = vmatprep.subr.mxu1 %v273_v45  ;;  %1586 = vmatpush3.msra.mxu0 %v225_v46  ;;  %v299_v10 = vld [vmem:[#allocation2 + $0x270] sm:$0xff]  ;;  %v314_v12 = vld [vmem:[#allocation2 + $0x2e8] sm:$0xff]  ;;  %v313_v16 = vld [vmem:[#allocation2 + $0x2e0] sm:$0xff] }
  0x4d   : > { %1621 = vmatpush3.msra.mxu1 %v257_v47  ;;  %1587 = vmatprep.subr.mxu0 %v240_v48  ;;  %v331_v11 = vld [vmem:[#allocation2 + $0x370] sm:$0xff]  ;;  %v346_v13 = vld [vmem:[#allocation2 + $0x3e8] sm:$0xff]  ;;  %v345_v17 = vld [vmem:[#allocation2 + $0x3e0] sm:$0xff] }
  0x4e   : > { %1622 = vmatprep.subr.mxu1 %v272_v49  ;;  %1588 = vmatpush3.msra.mxu0 %v224_v50  ;;  %v298_v14 = vld [vmem:[#allocation2 + $0x268] sm:$0xff]  ;;  %v297_v18 = vld [vmem:[#allocation2 + $0x260] sm:$0xff]  ;;  %v312_v20 = vld [vmem:[#allocation2 + $0x2d8] sm:$0xff] }
  0x4f   : > { %1623 = vmatpush3.msra.mxu1 %v256_v51  ;;  %1589 = vmatprep.subr.mxu0 %v239_v52  ;;  %v330_v15 = vld [vmem:[#allocation2 + $0x368] sm:$0xff]  ;;  %v329_v19 = vld [vmem:[#allocation2 + $0x360] sm:$0xff]  ;;  %v344_v21 = vld [vmem:[#allocation2 + $0x3d8] sm:$0xff] }
  0x50   : > { %1624 = vmatprep.subr.mxu1 %v271_v53  ;;  %1590 = vmatpush3.msra.mxu0 %v223_v54  ;;  %v296_v22 = vld [vmem:[#allocation2 + $0x258] sm:$0xff]  ;;  %v311_v24 = vld [vmem:[#allocation2 + $0x2d0] sm:$0xff]  ;;  %v310_v28 = vld [vmem:[#allocation2 + $0x2c8] sm:$0xff] }
  0x51   : > { %1625 = vmatpush3.msra.mxu1 %v255_v55  ;;  %1591 = vmatprep.subr.mxu0 %v238_v56  ;;  %v328_v23 = vld [vmem:[#allocation2 + $0x358] sm:$0xff]  ;;  %v343_v25 = vld [vmem:[#allocation2 + $0x3d0] sm:$0xff]  ;;  %v342_v29 = vld [vmem:[#allocation2 + $0x3c8] sm:$0xff] }
  0x52   : > { %1626 = vmatprep.subr.mxu1 %v270_v57  ;;  %1592 = vmatpush3.msra.mxu0 %v222_v58  ;;  %v295_v26 = vld [vmem:[#allocation2 + $0x250] sm:$0xff]  ;;  %v294_v30 = vld [vmem:[#allocation2 + $0x248] sm:$0xff]  ;;  %v309_v32 = vld [vmem:[#allocation2 + $0x2c0] sm:$0xff] }
  0x53   : > { %1627 = vmatpush3.msra.mxu1 %v254_v59  ;;  %1593 = vmatprep.subr.mxu0 %v237_v60  ;;  %v327_v27 = vld [vmem:[#allocation2 + $0x350] sm:$0xff]  ;;  %v326_v31 = vld [vmem:[#allocation2 + $0x348] sm:$0xff]  ;;  %v341_v33 = vld [vmem:[#allocation2 + $0x3c0] sm:$0xff] }
  0x54   : > { %1628 = vmatprep.subr.mxu1 %v269_v61  ;;  %1594 = vmatpush3.msra.mxu0 %v221_v62  ;;  %v293_v34 = vld [vmem:[#allocation2 + $0x240] sm:$0xff]  ;;  %v308_v36 = vld [vmem:[#allocation2 + $0x2b8] sm:$0xff]  ;;  %v307_v40 = vld [vmem:[#allocation2 + $0x2b0] sm:$0xff] }
  0x55   : > { %676 = vmatprep.mubr.f32.mxu0 %v198_v63  ;;  %1629 = vmatpush3.msra.mxu1 %v253_v0  ;;  %v325_v35 = vld [vmem:[#allocation2 + $0x340] sm:$0xff]  ;;  %v340_v37 = vld [vmem:[#allocation2 + $0x3b8] sm:$0xff]  ;;  %v339_v41 = vld [vmem:[#allocation2 + $0x3b0] sm:$0xff] }
  0x56   : > { %677 = vmatmul.mubr.f32.vlgmr.msra.gmra.mxu0 %v197_v1  ;;  %746 = vmatprep.mubr.f32.mxu1 %v200_v2  ;;  %v292_v38 = vld [vmem:[#allocation2 + $0x238] sm:$0xff]  ;;  %v291_v42 = vld [vmem:[#allocation2 + $0x230] sm:$0xff]  ;;  %v306_v44 = vld [vmem:[#allocation2 + $0x2a8] sm:$0xff] }
  0x57   : > { %1633 = vmatprep.subr.mxu0 %v316_v3  ;;  %1668 = vmatprep.subr.mxu1 %v348_v4  ;;  %v324_v39 = vld [vmem:[#allocation2 + $0x338] sm:$0xff]  ;;  %v323_v43 = vld [vmem:[#allocation2 + $0x330] sm:$0xff]  ;;  %v338_v45 = vld [vmem:[#allocation2 + $0x3a8] sm:$0xff] }
  0x58   : > { %747 = vmatmul.mubr.f32.vlgmr.msra.gmra.mxu1 %v199_v5  ;;  %1634 = vmatpush3.msra.mxu0 %v300_v6  ;;  %v290_v46 = vld [vmem:[#allocation2 + $0x228] sm:$0xff]  ;;  %v305_v48 = vld [vmem:[#allocation2 + $0x2a0] sm:$0xff]  ;;  %v304_v52 = vld [vmem:[#allocation2 + $0x298] sm:$0xff] }
  0x59   : > { %1669 = vmatpush3.msra.mxu1 %v332_v7  ;;  %1635 = vmatprep.subr.mxu0 %v315_v8  ;;  %v322_v47 = vld [vmem:[#allocation2 + $0x328] sm:$0xff]  ;;  %v337_v49 = vld [vmem:[#allocation2 + $0x3a0] sm:$0xff]  ;;  %v336_v53 = vld [vmem:[#allocation2 + $0x398] sm:$0xff] }
  0x5a   : > { %1670 = vmatprep.subr.mxu1 %v347_v9  ;;  %1636 = vmatpush3.msra.mxu0 %v299_v10  ;;  %v289_v50 = vld [vmem:[#allocation2 + $0x220] sm:$0xff]  ;;  %v288_v54 = vld [vmem:[#allocation2 + $0x218] sm:$0xff]  ;;  %v303_v56 = vld [vmem:[#allocation2 + $0x290] sm:$0xff] }
  0x5b   : > { %1671 = vmatpush3.msra.mxu1 %v331_v11  ;;  %1637 = vmatprep.subr.mxu0 %v314_v12  ;;  %v321_v51 = vld [vmem:[#allocation2 + $0x320] sm:$0xff]  ;;  %v320_v55 = vld [vmem:[#allocation2 + $0x318] sm:$0xff]  ;;  %v335_v57 = vld [vmem:[#allocation2 + $0x390] sm:$0xff] }
  0x5c   : > { %1672 = vmatprep.subr.mxu1 %v346_v13  ;;  %1638 = vmatpush3.msra.mxu0 %v298_v14  ;;  %v287_v58 = vld [vmem:[#allocation2 + $0x210] sm:$0xff]  ;;  %v302_v60 = vld [vmem:[#allocation2 + $0x288] sm:$0xff]  ;;  %v301_v0 = vld [vmem:[#allocation2 + $0x280] sm:$0xff] }
  0x5d   : > { %1673 = vmatpush3.msra.mxu1 %v330_v15  ;;  %1639 = vmatprep.subr.mxu0 %v313_v16  ;;  %v319_v59 = vld [vmem:[#allocation2 + $0x310] sm:$0xff]  ;;  %v334_v61 = vld [vmem:[#allocation2 + $0x388] sm:$0xff]  ;;  %v333_v1 = vld [vmem:[#allocation2 + $0x380] sm:$0xff] }
  0x5e   : > { %1674 = vmatprep.subr.mxu1 %v345_v17  ;;  %1640 = vmatpush3.msra.mxu0 %v297_v18  ;;  %v286_v62 = vld [vmem:[#allocation2 + $0x208] sm:$0xff]  ;;  %v285_v2 = vld [vmem:[#allocation2 + $0x200] sm:$0xff]  ;;  %v204_v6 = vld [vmem:[%s2292_s25 + $0x38] sm:$0xff] }
  0x5f   : > { %1675 = vmatpush3.msra.mxu1 %v329_v19  ;;  %1641 = vmatprep.subr.mxu0 %v312_v20  ;;  %v318_v63 = vld [vmem:[#allocation2 + $0x308] sm:$0xff]  ;;  %v317_v4 = vld [vmem:[#allocation2 + $0x300] sm:$0xff]  ;;  %v380_v7 = vld [vmem:[#allocation2 + $0x4f8] sm:$0xff] }
  0x60   : > { %1676 = vmatprep.subr.mxu1 %v344_v21  ;;  %1642 = vmatpush3.msra.mxu0 %v296_v22  ;;  %v202_v3 = vld [vmem:[%s2292_s25 + $0x28] sm:$0xff]  ;;  %v201_v5 = vld [vmem:[%s2292_s25 + $0x20] sm:$0xff]  ;;  %v412_v8 = vld [vmem:[#allocation2 + $0x5f8] sm:$0xff] }
  0x61   : > { %1677 = vmatpush3.msra.mxu1 %v328_v23  ;;  %1643 = vmatprep.subr.mxu0 %v311_v24  ;;  %v203_v9 = vld [vmem:[%s2292_s25 + $0x30] sm:$0xff]  ;;  %v364_v10 = vld [vmem:[#allocation2 + $0x478] sm:$0xff]  ;;  %v378_v16 = vld [vmem:[#allocation2 + $0x4e8] sm:$0xff] }
  0x62   : > { %1678 = vmatprep.subr.mxu1 %v343_v25  ;;  %1644 = vmatpush3.msra.mxu0 %v295_v26  ;;  %v396_v11 = vld [vmem:[#allocation2 + $0x578] sm:$0xff]  ;;  %v379_v12 = vld [vmem:[#allocation2 + $0x4f0] sm:$0xff]  ;;  %v410_v17 = vld [vmem:[#allocation2 + $0x5e8] sm:$0xff] }
  0x63   : > { %1679 = vmatpush3.msra.mxu1 %v327_v27  ;;  %1645 = vmatprep.subr.mxu0 %v310_v28  ;;  %v411_v13 = vld [vmem:[#allocation2 + $0x5f0] sm:$0xff]  ;;  %v362_v18 = vld [vmem:[#allocation2 + $0x468] sm:$0xff]  ;;  %v377_v20 = vld [vmem:[#allocation2 + $0x4e0] sm:$0xff] }
  0x64   : > { %1680 = vmatprep.subr.mxu1 %v342_v29  ;;  %1646 = vmatpush3.msra.mxu0 %v294_v30  ;;  %v363_v14 = vld [vmem:[#allocation2 + $0x470] sm:$0xff]  ;;  %v394_v19 = vld [vmem:[#allocation2 + $0x568] sm:$0xff]  ;;  %v409_v21 = vld [vmem:[#allocation2 + $0x5e0] sm:$0xff] }
  0x65   : > { %1681 = vmatpush3.msra.mxu1 %v326_v31  ;;  %1647 = vmatprep.subr.mxu0 %v309_v32  ;;  %v395_v15 = vld [vmem:[#allocation2 + $0x570] sm:$0xff]  ;;  %v361_v22 = vld [vmem:[#allocation2 + $0x460] sm:$0xff]  ;;  %v376_v24 = vld [vmem:[#allocation2 + $0x4d8] sm:$0xff] }
  0x66   : > { %1682 = vmatprep.subr.mxu1 %v341_v33  ;;  %1648 = vmatpush3.msra.mxu0 %v293_v34  ;;  %v393_v23 = vld [vmem:[#allocation2 + $0x560] sm:$0xff]  ;;  %v408_v25 = vld [vmem:[#allocation2 + $0x5d8] sm:$0xff]  ;;  %v375_v28 = vld [vmem:[#allocation2 + $0x4d0] sm:$0xff] }
  0x67   : > { %1683 = vmatpush3.msra.mxu1 %v325_v35  ;;  %1649 = vmatprep.subr.mxu0 %v308_v36  ;;  %v360_v26 = vld [vmem:[#allocation2 + $0x458] sm:$0xff]  ;;  %v407_v29 = vld [vmem:[#allocation2 + $0x5d0] sm:$0xff]  ;;  %v374_v32 = vld [vmem:[#allocation2 + $0x4c8] sm:$0xff] }
  0x68   : > { %1684 = vmatprep.subr.mxu1 %v340_v37  ;;  %1650 = vmatpush3.msra.mxu0 %v292_v38  ;;  %v392_v27 = vld [vmem:[#allocation2 + $0x558] sm:$0xff]  ;;  %v359_v30 = vld [vmem:[#allocation2 + $0x450] sm:$0xff]  ;;  %v406_v33 = vld [vmem:[#allocation2 + $0x5c8] sm:$0xff] }
  0x69   : > { %1685 = vmatpush3.msra.mxu1 %v324_v39  ;;  %1651 = vmatprep.subr.mxu0 %v307_v40  ;;  %v391_v31 = vld [vmem:[#allocation2 + $0x550] sm:$0xff]  ;;  %v358_v34 = vld [vmem:[#allocation2 + $0x448] sm:$0xff]  ;;  %v373_v36 = vld [vmem:[#allocation2 + $0x4c0] sm:$0xff] }
  0x6a   : > { %1686 = vmatprep.subr.mxu1 %v339_v41  ;;  %1652 = vmatpush3.msra.mxu0 %v291_v42  ;;  %v390_v35 = vld [vmem:[#allocation2 + $0x548] sm:$0xff]  ;;  %v405_v37 = vld [vmem:[#allocation2 + $0x5c0] sm:$0xff]  ;;  %v372_v40 = vld [vmem:[#allocation2 + $0x4b8] sm:$0xff] }
  0x6b   : > { %1687 = vmatpush3.msra.mxu1 %v323_v43  ;;  %1653 = vmatprep.subr.mxu0 %v306_v44  ;;  %v357_v38 = vld [vmem:[#allocation2 + $0x440] sm:$0xff]  ;;  %v404_v41 = vld [vmem:[#allocation2 + $0x5b8] sm:$0xff]  ;;  %v371_v44 = vld [vmem:[#allocation2 + $0x4b0] sm:$0xff] }
  0x6c   : > { %1688 = vmatprep.subr.mxu1 %v338_v45  ;;  %1654 = vmatpush3.msra.mxu0 %v290_v46  ;;  %v389_v39 = vld [vmem:[#allocation2 + $0x540] sm:$0xff]  ;;  %v356_v42 = vld [vmem:[#allocation2 + $0x438] sm:$0xff]  ;;  %v403_v45 = vld [vmem:[#allocation2 + $0x5b0] sm:$0xff] }
  0x6d   : > { %1689 = vmatpush3.msra.mxu1 %v322_v47  ;;  %1655 = vmatprep.subr.mxu0 %v305_v48  ;;  %v388_v43 = vld [vmem:[#allocation2 + $0x538] sm:$0xff]  ;;  %v355_v46 = vld [vmem:[#allocation2 + $0x430] sm:$0xff]  ;;  %v370_v48 = vld [vmem:[#allocation2 + $0x4a8] sm:$0xff] }
  0x6e   : > { %1690 = vmatprep.subr.mxu1 %v337_v49  ;;  %1656 = vmatpush3.msra.mxu0 %v289_v50  ;;  %v387_v47 = vld [vmem:[#allocation2 + $0x530] sm:$0xff]  ;;  %v402_v49 = vld [vmem:[#allocation2 + $0x5a8] sm:$0xff] }
  0x6f   : > { %1691 = vmatpush3.msra.mxu1 %v321_v51  ;;  %1657 = vmatprep.subr.mxu0 %v304_v52  ;;  %v354_v50 = vld [vmem:[#allocation2 + $0x428] sm:$0xff]  ;;  %v369_v52 = vld [vmem:[#allocation2 + $0x4a0] sm:$0xff] }
  0x70   : > { %1692 = vmatprep.subr.mxu1 %v336_v53  ;;  %1658 = vmatpush3.msra.mxu0 %v288_v54  ;;  %v386_v51 = vld [vmem:[#allocation2 + $0x528] sm:$0xff]  ;;  %v401_v53 = vld [vmem:[#allocation2 + $0x5a0] sm:$0xff] }
  0x71   : > { %1693 = vmatpush3.msra.mxu1 %v320_v55  ;;  %1659 = vmatprep.subr.mxu0 %v303_v56  ;;  %v353_v54 = vld [vmem:[#allocation2 + $0x420] sm:$0xff]  ;;  %v368_v56 = vld [vmem:[#allocation2 + $0x498] sm:$0xff] }
  0x72   : > { %1694 = vmatprep.subr.mxu1 %v335_v57  ;;  %1660 = vmatpush3.msra.mxu0 %v287_v58  ;;  %v385_v55 = vld [vmem:[#allocation2 + $0x520] sm:$0xff]  ;;  %v400_v57 = vld [vmem:[#allocation2 + $0x598] sm:$0xff] }
  0x73   : > { %1695 = vmatpush3.msra.mxu1 %v319_v59  ;;  %1661 = vmatprep.subr.mxu0 %v302_v60  ;;  %v352_v58 = vld [vmem:[#allocation2 + $0x418] sm:$0xff]  ;;  %v367_v60 = vld [vmem:[#allocation2 + $0x490] sm:$0xff] }
  0x74   : > { %1696 = vmatprep.subr.mxu1 %v334_v61  ;;  %1662 = vmatpush3.msra.mxu0 %v286_v62  ;;  %v384_v59 = vld [vmem:[#allocation2 + $0x518] sm:$0xff]  ;;  %v399_v61 = vld [vmem:[#allocation2 + $0x590] sm:$0xff] }
  0x75   : > { %1697 = vmatpush3.msra.mxu1 %v318_v63  ;;  %1663 = vmatprep.subr.mxu0 %v301_v0  ;;  %v351_v62 = vld [vmem:[#allocation2 + $0x410] sm:$0xff]  ;;  %v366_v0 = vld [vmem:[#allocation2 + $0x488] sm:$0xff] }
  0x76   : > { %1698 = vmatprep.subr.mxu1 %v333_v1  ;;  %1664 = vmatpush3.msra.mxu0 %v285_v2  ;;  %v383_v63 = vld [vmem:[#allocation2 + $0x510] sm:$0xff]  ;;  %v398_v1 = vld [vmem:[#allocation2 + $0x588] sm:$0xff] }
  0x77   : > { %816 = vmatprep.mubr.f32.mxu0 %v202_v3  ;;  %1699 = vmatpush3.msra.mxu1 %v317_v4  ;;  %v350_v2 = vld [vmem:[#allocation2 + $0x408] sm:$0xff]  ;;  %v365_v4 = vld [vmem:[#allocation2 + $0x480] sm:$0xff] }
  0x78   : > { %817 = vmatmul.mubr.f32.vlgmr.msra.gmra.mxu0 %v201_v5  ;;  %886 = vmatprep.mubr.f32.mxu1 %v204_v6  ;;  %v382_v3 = vld [vmem:[#allocation2 + $0x508] sm:$0xff]  ;;  %v397_v5 = vld [vmem:[#allocation2 + $0x580] sm:$0xff] }
  0x79   : > { %1703 = vmatprep.subr.mxu0 %v380_v7  ;;  %1738 = vmatprep.subr.mxu1 %v412_v8  ;;  %v349_v6 = vld [vmem:[#allocation2 + $0x400] sm:$0xff]  ;;  %v206_v7 = vld [vmem:[%s2292_s25 + $0x48] sm:$0xff] }
  0x7a   : > { %887 = vmatmul.mubr.f32.vlgmr.msra.gmra.mxu1 %v203_v9  ;;  %1704 = vmatpush3.msra.mxu0 %v364_v10  ;;  %v381_v8 = vld [vmem:[#allocation2 + $0x500] sm:$0xff]  ;;  %v208_v10 = vld [vmem:[%s2292_s25 + $0x58] sm:$0xff] }
  0x7b   : > { %1739 = vmatpush3.msra.mxu1 %v396_v11  ;;  %1705 = vmatprep.subr.mxu0 %v379_v12  ;;  %v205_v9 = vld [vmem:[%s2292_s25 + $0x40] sm:$0xff]  ;;  %v444_v11 = vld [vmem:[#allocation2 + $0x6f8] sm:$0xff] }
  0x7c   : > { %1740 = vmatprep.subr.mxu1 %v411_v13  ;;  %1706 = vmatpush3.msra.mxu0 %v363_v14  ;;  %v476_v12 = vld [vmem:[#allocation2 + $0x7f8] sm:$0xff]  ;;  %v207_v13 = vld [vmem:[%s2292_s25 + $0x50] sm:$0xff] }
  0x7d   : > { %1741 = vmatpush3.msra.mxu1 %v395_v15  ;;  %1707 = vmatprep.subr.mxu0 %v378_v16  ;;  %v428_v14 = vld [vmem:[#allocation2 + $0x678] sm:$0xff]  ;;  %v443_v16 = vld [vmem:[#allocation2 + $0x6f0] sm:$0xff] }
  0x7e   : > { %1742 = vmatprep.subr.mxu1 %v410_v17  ;;  %1708 = vmatpush3.msra.mxu0 %v362_v18  ;;  %v460_v15 = vld [vmem:[#allocation2 + $0x778] sm:$0xff]  ;;  %v475_v17 = vld [vmem:[#allocation2 + $0x7f0] sm:$0xff] }
  0x7f   : > { %1743 = vmatpush3.msra.mxu1 %v394_v19  ;;  %1709 = vmatprep.subr.mxu0 %v377_v20  ;;  %v427_v18 = vld [vmem:[#allocation2 + $0x670] sm:$0xff]  ;;  %v442_v20 = vld [vmem:[#allocation2 + $0x6e8] sm:$0xff] }
  0x80   : > { %1744 = vmatprep.subr.mxu1 %v409_v21  ;;  %1710 = vmatpush3.msra.mxu0 %v361_v22  ;;  %v459_v19 = vld [vmem:[#allocation2 + $0x770] sm:$0xff]  ;;  %v474_v21 = vld [vmem:[#allocation2 + $0x7e8] sm:$0xff] }
  0x81   : > { %1745 = vmatpush3.msra.mxu1 %v393_v23  ;;  %1711 = vmatprep.subr.mxu0 %v376_v24  ;;  %v426_v22 = vld [vmem:[#allocation2 + $0x668] sm:$0xff]  ;;  %v441_v24 = vld [vmem:[#allocation2 + $0x6e0] sm:$0xff] }
  0x82   : > { %1746 = vmatprep.subr.mxu1 %v408_v25  ;;  %1712 = vmatpush3.msra.mxu0 %v360_v26  ;;  %v458_v23 = vld [vmem:[#allocation2 + $0x768] sm:$0xff]  ;;  %v473_v25 = vld [vmem:[#allocation2 + $0x7e0] sm:$0xff] }
  0x83   : > { %1747 = vmatpush3.msra.mxu1 %v392_v27  ;;  %1713 = vmatprep.subr.mxu0 %v375_v28  ;;  %v425_v26 = vld [vmem:[#allocation2 + $0x660] sm:$0xff]  ;;  %v440_v28 = vld [vmem:[#allocation2 + $0x6d8] sm:$0xff] }
  0x84   : > { %1748 = vmatprep.subr.mxu1 %v407_v29  ;;  %1714 = vmatpush3.msra.mxu0 %v359_v30  ;;  %v457_v27 = vld [vmem:[#allocation2 + $0x760] sm:$0xff]  ;;  %v472_v29 = vld [vmem:[#allocation2 + $0x7d8] sm:$0xff] }
  0x85   : > { %1749 = vmatpush3.msra.mxu1 %v391_v31  ;;  %1715 = vmatprep.subr.mxu0 %v374_v32  ;;  %v424_v30 = vld [vmem:[#allocation2 + $0x658] sm:$0xff]  ;;  %v439_v32 = vld [vmem:[#allocation2 + $0x6d0] sm:$0xff] }
  0x86   : > { %1750 = vmatprep.subr.mxu1 %v406_v33  ;;  %1716 = vmatpush3.msra.mxu0 %v358_v34  ;;  %v456_v31 = vld [vmem:[#allocation2 + $0x758] sm:$0xff]  ;;  %v471_v33 = vld [vmem:[#allocation2 + $0x7d0] sm:$0xff] }
  0x87   : > { %1751 = vmatpush3.msra.mxu1 %v390_v35  ;;  %1717 = vmatprep.subr.mxu0 %v373_v36  ;;  %v423_v34 = vld [vmem:[#allocation2 + $0x650] sm:$0xff]  ;;  %v438_v36 = vld [vmem:[#allocation2 + $0x6c8] sm:$0xff] }
  0x88   : > { %1752 = vmatprep.subr.mxu1 %v405_v37  ;;  %1718 = vmatpush3.msra.mxu0 %v357_v38  ;;  %v455_v35 = vld [vmem:[#allocation2 + $0x750] sm:$0xff]  ;;  %v470_v37 = vld [vmem:[#allocation2 + $0x7c8] sm:$0xff] }
  0x89   : > { %1753 = vmatpush3.msra.mxu1 %v389_v39  ;;  %1719 = vmatprep.subr.mxu0 %v372_v40  ;;  %v422_v38 = vld [vmem:[#allocation2 + $0x648] sm:$0xff]  ;;  %v437_v40 = vld [vmem:[#allocation2 + $0x6c0] sm:$0xff] }
  0x8a   : > { %1754 = vmatprep.subr.mxu1 %v404_v41  ;;  %1720 = vmatpush3.msra.mxu0 %v356_v42  ;;  %v454_v39 = vld [vmem:[#allocation2 + $0x748] sm:$0xff]  ;;  %v469_v41 = vld [vmem:[#allocation2 + $0x7c0] sm:$0xff] }
  0x8b   : > { %1755 = vmatpush3.msra.mxu1 %v388_v43  ;;  %1721 = vmatprep.subr.mxu0 %v371_v44  ;;  %v421_v42 = vld [vmem:[#allocation2 + $0x640] sm:$0xff]  ;;  %v436_v44 = vld [vmem:[#allocation2 + $0x6b8] sm:$0xff] }
  0x8c   : > { %1756 = vmatprep.subr.mxu1 %v403_v45  ;;  %1722 = vmatpush3.msra.mxu0 %v355_v46  ;;  %v453_v43 = vld [vmem:[#allocation2 + $0x740] sm:$0xff]  ;;  %v468_v45 = vld [vmem:[#allocation2 + $0x7b8] sm:$0xff] }
  0x8d   : > { %1757 = vmatpush3.msra.mxu1 %v387_v47  ;;  %1723 = vmatprep.subr.mxu0 %v370_v48  ;;  %v420_v46 = vld [vmem:[#allocation2 + $0x638] sm:$0xff]  ;;  %v435_v48 = vld [vmem:[#allocation2 + $0x6b0] sm:$0xff] }
  0x8e   : > { %1758 = vmatprep.subr.mxu1 %v402_v49  ;;  %1724 = vmatpush3.msra.mxu0 %v354_v50  ;;  %v452_v47 = vld [vmem:[#allocation2 + $0x738] sm:$0xff]  ;;  %v467_v49 = vld [vmem:[#allocation2 + $0x7b0] sm:$0xff] }
  0x8f   : > { %1759 = vmatpush3.msra.mxu1 %v386_v51  ;;  %1725 = vmatprep.subr.mxu0 %v369_v52  ;;  %v419_v50 = vld [vmem:[#allocation2 + $0x630] sm:$0xff]  ;;  %v434_v52 = vld [vmem:[#allocation2 + $0x6a8] sm:$0xff] }
  0x90   : > { %1760 = vmatprep.subr.mxu1 %v401_v53  ;;  %1726 = vmatpush3.msra.mxu0 %v353_v54  ;;  %v451_v51 = vld [vmem:[#allocation2 + $0x730] sm:$0xff]  ;;  %v466_v53 = vld [vmem:[#allocation2 + $0x7a8] sm:$0xff] }
  0x91   : > { %1761 = vmatpush3.msra.mxu1 %v385_v55  ;;  %1727 = vmatprep.subr.mxu0 %v368_v56  ;;  %v418_v54 = vld [vmem:[#allocation2 + $0x628] sm:$0xff]  ;;  %v433_v56 = vld [vmem:[#allocation2 + $0x6a0] sm:$0xff] }
  0x92   : > { %1762 = vmatprep.subr.mxu1 %v400_v57  ;;  %1728 = vmatpush3.msra.mxu0 %v352_v58  ;;  %v450_v55 = vld [vmem:[#allocation2 + $0x728] sm:$0xff]  ;;  %v465_v57 = vld [vmem:[#allocation2 + $0x7a0] sm:$0xff] }
  0x93   : > { %1763 = vmatpush3.msra.mxu1 %v384_v59  ;;  %1729 = vmatprep.subr.mxu0 %v367_v60  ;;  %v417_v58 = vld [vmem:[#allocation2 + $0x620] sm:$0xff]  ;;  %v432_v60 = vld [vmem:[#allocation2 + $0x698] sm:$0xff] }
  0x94   : > { %1764 = vmatprep.subr.mxu1 %v399_v61  ;;  %1730 = vmatpush3.msra.mxu0 %v351_v62  ;;  %v449_v59 = vld [vmem:[#allocation2 + $0x720] sm:$0xff]  ;;  %v464_v61 = vld [vmem:[#allocation2 + $0x798] sm:$0xff] }
  0x95   : > { %1765 = vmatpush3.msra.mxu1 %v383_v63  ;;  %1731 = vmatprep.subr.mxu0 %v366_v0  ;;  %v416_v62 = vld [vmem:[#allocation2 + $0x618] sm:$0xff]  ;;  %v431_v0 = vld [vmem:[#allocation2 + $0x690] sm:$0xff] }
  0x96   : > { %1766 = vmatprep.subr.mxu1 %v398_v1  ;;  %1732 = vmatpush3.msra.mxu0 %v350_v2  ;;  %v448_v63 = vld [vmem:[#allocation2 + $0x718] sm:$0xff]  ;;  %v463_v1 = vld [vmem:[#allocation2 + $0x790] sm:$0xff] }
  0x97   : > { %1767 = vmatpush3.msra.mxu1 %v382_v3  ;;  %1733 = vmatprep.subr.mxu0 %v365_v4  ;;  %v415_v2 = vld [vmem:[#allocation2 + $0x610] sm:$0xff]  ;;  %v430_v4 = vld [vmem:[#allocation2 + $0x688] sm:$0xff] }
  0x98   : > { %1768 = vmatprep.subr.mxu1 %v397_v5  ;;  %1734 = vmatpush3.msra.mxu0 %v349_v6  ;;  %v447_v3 = vld [vmem:[#allocation2 + $0x710] sm:$0xff]  ;;  %v462_v5 = vld [vmem:[#allocation2 + $0x788] sm:$0xff] }
  0x99   : > { %956 = vmatprep.mubr.f32.mxu0 %v206_v7  ;;  %1769 = vmatpush3.msra.mxu1 %v381_v8  ;;  %v414_v6 = vld [vmem:[#allocation2 + $0x608] sm:$0xff]  ;;  %v429_v8 = vld [vmem:[#allocation2 + $0x680] sm:$0xff] }
  0x9a   : > { %957 = vmatmul.mubr.f32.vlgmr.msra.gmra.mxu0 %v205_v9  ;;  %1026 = vmatprep.mubr.f32.mxu1 %v208_v10  ;;  %v446_v7 = vld [vmem:[#allocation2 + $0x708] sm:$0xff]  ;;  %v461_v9 = vld [vmem:[#allocation2 + $0x780] sm:$0xff] }
  0x9b   : > { %1773 = vmatprep.subr.mxu0 %v444_v11  ;;  %1808 = vmatprep.subr.mxu1 %v476_v12  ;;  %v413_v10 = vld [vmem:[#allocation2 + $0x600] sm:$0xff]  ;;  %v210_v11 = vld [vmem:[%s2292_s25 + $0x68] sm:$0xff] }
  0x9c   : > { %1027 = vmatmul.mubr.f32.vlgmr.msra.gmra.mxu1 %v207_v13  ;;  %1774 = vmatpush3.msra.mxu0 %v428_v14  ;;  %v445_v12 = vld [vmem:[#allocation2 + $0x700] sm:$0xff]  ;;  %v212_v14 = vld [vmem:[%s2292_s25 + $0x78] sm:$0xff] }
  0x9d   : > { %1809 = vmatpush3.msra.mxu1 %v460_v15  ;;  %1775 = vmatprep.subr.mxu0 %v443_v16  ;;  %v209_v13 = vld [vmem:[%s2292_s25 + $0x60] sm:$0xff]  ;;  %v508_v15 = vld [vmem:[#allocation2 + $0x8f8] sm:$0xff] }
  0x9e   : > { %1810 = vmatprep.subr.mxu1 %v475_v17  ;;  %1776 = vmatpush3.msra.mxu0 %v427_v18  ;;  %v540_v16 = vld [vmem:[#allocation2 + $0x9f8] sm:$0xff]  ;;  %v211_v17 = vld [vmem:[%s2292_s25 + $0x70] sm:$0xff] }
  0x9f   : > { %1811 = vmatpush3.msra.mxu1 %v459_v19  ;;  %1777 = vmatprep.subr.mxu0 %v442_v20  ;;  %v492_v18 = vld [vmem:[#allocation2 + $0x878] sm:$0xff]  ;;  %v507_v20 = vld [vmem:[#allocation2 + $0x8f0] sm:$0xff] }
  0xa0   : > { %1812 = vmatprep.subr.mxu1 %v474_v21  ;;  %1778 = vmatpush3.msra.mxu0 %v426_v22  ;;  %v524_v19 = vld [vmem:[#allocation2 + $0x978] sm:$0xff]  ;;  %v539_v21 = vld [vmem:[#allocation2 + $0x9f0] sm:$0xff] }
  0xa1   : > { %1813 = vmatpush3.msra.mxu1 %v458_v23  ;;  %1779 = vmatprep.subr.mxu0 %v441_v24  ;;  %v491_v22 = vld [vmem:[#allocation2 + $0x870] sm:$0xff]  ;;  %v506_v24 = vld [vmem:[#allocation2 + $0x8e8] sm:$0xff] }
  0xa2   : > { %1814 = vmatprep.subr.mxu1 %v473_v25  ;;  %1780 = vmatpush3.msra.mxu0 %v425_v26  ;;  %v523_v23 = vld [vmem:[#allocation2 + $0x970] sm:$0xff]  ;;  %v538_v25 = vld [vmem:[#allocation2 + $0x9e8] sm:$0xff] }
  0xa3   : > { %1815 = vmatpush3.msra.mxu1 %v457_v27  ;;  %1781 = vmatprep.subr.mxu0 %v440_v28  ;;  %v490_v26 = vld [vmem:[#allocation2 + $0x868] sm:$0xff]  ;;  %v505_v28 = vld [vmem:[#allocation2 + $0x8e0] sm:$0xff] }
  0xa4   : > { %1816 = vmatprep.subr.mxu1 %v472_v29  ;;  %1782 = vmatpush3.msra.mxu0 %v424_v30  ;;  %v522_v27 = vld [vmem:[#allocation2 + $0x968] sm:$0xff]  ;;  %v537_v29 = vld [vmem:[#allocation2 + $0x9e0] sm:$0xff] }
  0xa5   : > { %1817 = vmatpush3.msra.mxu1 %v456_v31  ;;  %1783 = vmatprep.subr.mxu0 %v439_v32  ;;  %v489_v30 = vld [vmem:[#allocation2 + $0x860] sm:$0xff]  ;;  %v504_v32 = vld [vmem:[#allocation2 + $0x8d8] sm:$0xff] }
  0xa6   : > { %1818 = vmatprep.subr.mxu1 %v471_v33  ;;  %1784 = vmatpush3.msra.mxu0 %v423_v34  ;;  %v521_v31 = vld [vmem:[#allocation2 + $0x960] sm:$0xff]  ;;  %v536_v33 = vld [vmem:[#allocation2 + $0x9d8] sm:$0xff] }
  0xa7   : > { %1819 = vmatpush3.msra.mxu1 %v455_v35  ;;  %1785 = vmatprep.subr.mxu0 %v438_v36  ;;  %v488_v34 = vld [vmem:[#allocation2 + $0x858] sm:$0xff]  ;;  %v503_v36 = vld [vmem:[#allocation2 + $0x8d0] sm:$0xff] }
  0xa8   : > { %1820 = vmatprep.subr.mxu1 %v470_v37  ;;  %1786 = vmatpush3.msra.mxu0 %v422_v38  ;;  %v520_v35 = vld [vmem:[#allocation2 + $0x958] sm:$0xff]  ;;  %v535_v37 = vld [vmem:[#allocation2 + $0x9d0] sm:$0xff] }
  0xa9   : > { %1821 = vmatpush3.msra.mxu1 %v454_v39  ;;  %1787 = vmatprep.subr.mxu0 %v437_v40  ;;  %v487_v38 = vld [vmem:[#allocation2 + $0x850] sm:$0xff]  ;;  %v502_v40 = vld [vmem:[#allocation2 + $0x8c8] sm:$0xff] }
  0xaa   : > { %1822 = vmatprep.subr.mxu1 %v469_v41  ;;  %1788 = vmatpush3.msra.mxu0 %v421_v42  ;;  %v519_v39 = vld [vmem:[#allocation2 + $0x950] sm:$0xff]  ;;  %v534_v41 = vld [vmem:[#allocation2 + $0x9c8] sm:$0xff] }
  0xab   : > { %1823 = vmatpush3.msra.mxu1 %v453_v43  ;;  %1789 = vmatprep.subr.mxu0 %v436_v44  ;;  %v486_v42 = vld [vmem:[#allocation2 + $0x848] sm:$0xff]  ;;  %v501_v44 = vld [vmem:[#allocation2 + $0x8c0] sm:$0xff] }
  0xac   : > { %1824 = vmatprep.subr.mxu1 %v468_v45  ;;  %1790 = vmatpush3.msra.mxu0 %v420_v46  ;;  %v518_v43 = vld [vmem:[#allocation2 + $0x948] sm:$0xff]  ;;  %v533_v45 = vld [vmem:[#allocation2 + $0x9c0] sm:$0xff] }
  0xad   : > { %1825 = vmatpush3.msra.mxu1 %v452_v47  ;;  %1791 = vmatprep.subr.mxu0 %v435_v48  ;;  %v485_v46 = vld [vmem:[#allocation2 + $0x840] sm:$0xff]  ;;  %v500_v48 = vld [vmem:[#allocation2 + $0x8b8] sm:$0xff] }
  0xae   : > { %1826 = vmatprep.subr.mxu1 %v467_v49  ;;  %1792 = vmatpush3.msra.mxu0 %v419_v50  ;;  %v517_v47 = vld [vmem:[#allocation2 + $0x940] sm:$0xff]  ;;  %v532_v49 = vld [vmem:[#allocation2 + $0x9b8] sm:$0xff] }
  0xaf   : > { %1827 = vmatpush3.msra.mxu1 %v451_v51  ;;  %1793 = vmatprep.subr.mxu0 %v434_v52  ;;  %v484_v50 = vld [vmem:[#allocation2 + $0x838] sm:$0xff]  ;;  %v499_v52 = vld [vmem:[#allocation2 + $0x8b0] sm:$0xff] }
  0xb0   : > { %1828 = vmatprep.subr.mxu1 %v466_v53  ;;  %1794 = vmatpush3.msra.mxu0 %v418_v54  ;;  %v516_v51 = vld [vmem:[#allocation2 + $0x938] sm:$0xff]  ;;  %v531_v53 = vld [vmem:[#allocation2 + $0x9b0] sm:$0xff] }
  0xb1   : > { %1829 = vmatpush3.msra.mxu1 %v450_v55  ;;  %1795 = vmatprep.subr.mxu0 %v433_v56  ;;  %v483_v54 = vld [vmem:[#allocation2 + $0x830] sm:$0xff]  ;;  %v498_v56 = vld [vmem:[#allocation2 + $0x8a8] sm:$0xff] }
  0xb2   : > { %1830 = vmatprep.subr.mxu1 %v465_v57  ;;  %1796 = vmatpush3.msra.mxu0 %v417_v58  ;;  %v515_v55 = vld [vmem:[#allocation2 + $0x930] sm:$0xff]  ;;  %v530_v57 = vld [vmem:[#allocation2 + $0x9a8] sm:$0xff] }
  0xb3   : > { %1831 = vmatpush3.msra.mxu1 %v449_v59  ;;  %1797 = vmatprep.subr.mxu0 %v432_v60  ;;  %v482_v58 = vld [vmem:[#allocation2 + $0x828] sm:$0xff]  ;;  %v497_v60 = vld [vmem:[#allocation2 + $0x8a0] sm:$0xff] }
  0xb4   : > { %1832 = vmatprep.subr.mxu1 %v464_v61  ;;  %1798 = vmatpush3.msra.mxu0 %v416_v62  ;;  %v514_v59 = vld [vmem:[#allocation2 + $0x928] sm:$0xff]  ;;  %v529_v61 = vld [vmem:[#allocation2 + $0x9a0] sm:$0xff] }
  0xb5   : > { %1833 = vmatpush3.msra.mxu1 %v448_v63  ;;  %1799 = vmatprep.subr.mxu0 %v431_v0  ;;  %v481_v62 = vld [vmem:[#allocation2 + $0x820] sm:$0xff]  ;;  %v496_v0 = vld [vmem:[#allocation2 + $0x898] sm:$0xff] }
  0xb6   : > { %1834 = vmatprep.subr.mxu1 %v463_v1  ;;  %1800 = vmatpush3.msra.mxu0 %v415_v2  ;;  %v513_v63 = vld [vmem:[#allocation2 + $0x920] sm:$0xff]  ;;  %v528_v1 = vld [vmem:[#allocation2 + $0x998] sm:$0xff] }
  0xb7   : > { %1835 = vmatpush3.msra.mxu1 %v447_v3  ;;  %1801 = vmatprep.subr.mxu0 %v430_v4  ;;  %v480_v2 = vld [vmem:[#allocation2 + $0x818] sm:$0xff]  ;;  %v495_v4 = vld [vmem:[#allocation2 + $0x890] sm:$0xff] }
  0xb8   : > { %1836 = vmatprep.subr.mxu1 %v462_v5  ;;  %1802 = vmatpush3.msra.mxu0 %v414_v6  ;;  %v512_v3 = vld [vmem:[#allocation2 + $0x918] sm:$0xff]  ;;  %v527_v5 = vld [vmem:[#allocation2 + $0x990] sm:$0xff] }
  0xb9   : > { %1837 = vmatpush3.msra.mxu1 %v446_v7  ;;  %1803 = vmatprep.subr.mxu0 %v429_v8  ;;  %v479_v6 = vld [vmem:[#allocation2 + $0x810] sm:$0xff]  ;;  %v494_v8 = vld [vmem:[#allocation2 + $0x888] sm:$0xff] }
  0xba   : > { %1838 = vmatprep.subr.mxu1 %v461_v9  ;;  %1804 = vmatpush3.msra.mxu0 %v413_v10  ;;  %v511_v7 = vld [vmem:[#allocation2 + $0x910] sm:$0xff]  ;;  %v526_v9 = vld [vmem:[#allocation2 + $0x988] sm:$0xff] }
  0xbb   : > { %1096 = vmatprep.mubr.f32.mxu0 %v210_v11  ;;  %1839 = vmatpush3.msra.mxu1 %v445_v12  ;;  %v478_v10 = vld [vmem:[#allocation2 + $0x808] sm:$0xff]  ;;  %v493_v12 = vld [vmem:[#allocation2 + $0x880] sm:$0xff] }
  0xbc   : > { %1097 = vmatmul.mubr.f32.vlgmr.msra.gmra.mxu0 %v209_v13  ;;  %1166 = vmatprep.mubr.f32.mxu1 %v212_v14  ;;  %v510_v11 = vld [vmem:[#allocation2 + $0x908] sm:$0xff]  ;;  %v525_v13 = vld [vmem:[#allocation2 + $0x980] sm:$0xff] }
  0xbd   : > { %1843 = vmatprep.subr.mxu0 %v508_v15  ;;  %1878 = vmatprep.subr.mxu1 %v540_v16  ;;  %v477_v14 = vld [vmem:[#allocation2 + $0x800] sm:$0xff]  ;;  %v214_v15 = vld [vmem:[%s2292_s25 + $0x88] sm:$0xff] }
  0xbe   : > { %1167 = vmatmul.mubr.f32.vlgmr.msra.gmra.mxu1 %v211_v17  ;;  %1844 = vmatpush3.msra.mxu0 %v492_v18  ;;  %v509_v16 = vld [vmem:[#allocation2 + $0x900] sm:$0xff]  ;;  %v216_v18 = vld [vmem:[%s2292_s25 + $0x98] sm:$0xff] }
  0xbf   : > { %1879 = vmatpush3.msra.mxu1 %v524_v19  ;;  %1845 = vmatprep.subr.mxu0 %v507_v20  ;;  %v213_v17 = vld [vmem:[%s2292_s25 + $0x80] sm:$0xff]  ;;  %v572_v19 = vld [vmem:[#allocation2 + $0xaf8] sm:$0xff] }
  0xc0   : > { %1880 = vmatprep.subr.mxu1 %v539_v21  ;;  %1846 = vmatpush3.msra.mxu0 %v491_v22  ;;  %v604_v20 = vld [vmem:[#allocation2 + $0xbf8] sm:$0xff]  ;;  %v215_v21 = vld [vmem:[%s2292_s25 + $0x90] sm:$0xff] }
  0xc1   : > { %1881 = vmatpush3.msra.mxu1 %v523_v23  ;;  %1847 = vmatprep.subr.mxu0 %v506_v24  ;;  %v556_v22 = vld [vmem:[#allocation2 + $0xa78] sm:$0xff]  ;;  %v571_v24 = vld [vmem:[#allocation2 + $0xaf0] sm:$0xff] }
  0xc2   : > { %1882 = vmatprep.subr.mxu1 %v538_v25  ;;  %1848 = vmatpush3.msra.mxu0 %v490_v26  ;;  %v588_v23 = vld [vmem:[#allocation2 + $0xb78] sm:$0xff]  ;;  %v603_v25 = vld [vmem:[#allocation2 + $0xbf0] sm:$0xff] }
  0xc3   : > { %1883 = vmatpush3.msra.mxu1 %v522_v27  ;;  %1849 = vmatprep.subr.mxu0 %v505_v28  ;;  %v555_v26 = vld [vmem:[#allocation2 + $0xa70] sm:$0xff]  ;;  %v570_v28 = vld [vmem:[#allocation2 + $0xae8] sm:$0xff] }
  0xc4   : > { %1884 = vmatprep.subr.mxu1 %v537_v29  ;;  %1850 = vmatpush3.msra.mxu0 %v489_v30  ;;  %v587_v27 = vld [vmem:[#allocation2 + $0xb70] sm:$0xff]  ;;  %v602_v29 = vld [vmem:[#allocation2 + $0xbe8] sm:$0xff] }
  0xc5   : > { %1885 = vmatpush3.msra.mxu1 %v521_v31  ;;  %1851 = vmatprep.subr.mxu0 %v504_v32  ;;  %v554_v30 = vld [vmem:[#allocation2 + $0xa68] sm:$0xff]  ;;  %v569_v32 = vld [vmem:[#allocation2 + $0xae0] sm:$0xff] }
  0xc6   : > { %1886 = vmatprep.subr.mxu1 %v536_v33  ;;  %1852 = vmatpush3.msra.mxu0 %v488_v34  ;;  %v586_v31 = vld [vmem:[#allocation2 + $0xb68] sm:$0xff]  ;;  %v601_v33 = vld [vmem:[#allocation2 + $0xbe0] sm:$0xff] }
  0xc7   : > { %1887 = vmatpush3.msra.mxu1 %v520_v35  ;;  %1853 = vmatprep.subr.mxu0 %v503_v36  ;;  %v553_v34 = vld [vmem:[#allocation2 + $0xa60] sm:$0xff]  ;;  %v568_v36 = vld [vmem:[#allocation2 + $0xad8] sm:$0xff] }
  0xc8   : > { %1888 = vmatprep.subr.mxu1 %v535_v37  ;;  %1854 = vmatpush3.msra.mxu0 %v487_v38  ;;  %v585_v35 = vld [vmem:[#allocation2 + $0xb60] sm:$0xff]  ;;  %v600_v37 = vld [vmem:[#allocation2 + $0xbd8] sm:$0xff] }
  0xc9   : > { %1889 = vmatpush3.msra.mxu1 %v519_v39  ;;  %1855 = vmatprep.subr.mxu0 %v502_v40  ;;  %v552_v38 = vld [vmem:[#allocation2 + $0xa58] sm:$0xff]  ;;  %v567_v40 = vld [vmem:[#allocation2 + $0xad0] sm:$0xff] }
  0xca   : > { %1890 = vmatprep.subr.mxu1 %v534_v41  ;;  %1856 = vmatpush3.msra.mxu0 %v486_v42  ;;  %v584_v39 = vld [vmem:[#allocation2 + $0xb58] sm:$0xff]  ;;  %v599_v41 = vld [vmem:[#allocation2 + $0xbd0] sm:$0xff] }
  0xcb   : > { %1891 = vmatpush3.msra.mxu1 %v518_v43  ;;  %1857 = vmatprep.subr.mxu0 %v501_v44  ;;  %v551_v42 = vld [vmem:[#allocation2 + $0xa50] sm:$0xff]  ;;  %v566_v44 = vld [vmem:[#allocation2 + $0xac8] sm:$0xff] }
  0xcc   : > { %1892 = vmatprep.subr.mxu1 %v533_v45  ;;  %1858 = vmatpush3.msra.mxu0 %v485_v46  ;;  %v583_v43 = vld [vmem:[#allocation2 + $0xb50] sm:$0xff]  ;;  %v598_v45 = vld [vmem:[#allocation2 + $0xbc8] sm:$0xff] }
  0xcd   : > { %1893 = vmatpush3.msra.mxu1 %v517_v47  ;;  %1859 = vmatprep.subr.mxu0 %v500_v48  ;;  %v550_v46 = vld [vmem:[#allocation2 + $0xa48] sm:$0xff]  ;;  %v565_v48 = vld [vmem:[#allocation2 + $0xac0] sm:$0xff] }
  0xce   : > { %1894 = vmatprep.subr.mxu1 %v532_v49  ;;  %1860 = vmatpush3.msra.mxu0 %v484_v50  ;;  %v582_v47 = vld [vmem:[#allocation2 + $0xb48] sm:$0xff]  ;;  %v597_v49 = vld [vmem:[#allocation2 + $0xbc0] sm:$0xff] }
  0xcf   : > { %1895 = vmatpush3.msra.mxu1 %v516_v51  ;;  %1861 = vmatprep.subr.mxu0 %v499_v52  ;;  %v549_v50 = vld [vmem:[#allocation2 + $0xa40] sm:$0xff]  ;;  %v564_v52 = vld [vmem:[#allocation2 + $0xab8] sm:$0xff] }
  0xd0   : > { %1896 = vmatprep.subr.mxu1 %v531_v53  ;;  %1862 = vmatpush3.msra.mxu0 %v483_v54  ;;  %v581_v51 = vld [vmem:[#allocation2 + $0xb40] sm:$0xff]  ;;  %v596_v53 = vld [vmem:[#allocation2 + $0xbb8] sm:$0xff] }
  0xd1   : > { %1897 = vmatpush3.msra.mxu1 %v515_v55  ;;  %1863 = vmatprep.subr.mxu0 %v498_v56  ;;  %v548_v54 = vld [vmem:[#allocation2 + $0xa38] sm:$0xff]  ;;  %v563_v56 = vld [vmem:[#allocation2 + $0xab0] sm:$0xff] }
  0xd2   : > { %1898 = vmatprep.subr.mxu1 %v530_v57  ;;  %1864 = vmatpush3.msra.mxu0 %v482_v58  ;;  %v580_v55 = vld [vmem:[#allocation2 + $0xb38] sm:$0xff]  ;;  %v595_v57 = vld [vmem:[#allocation2 + $0xbb0] sm:$0xff] }
  0xd3   : > { %1899 = vmatpush3.msra.mxu1 %v514_v59  ;;  %1865 = vmatprep.subr.mxu0 %v497_v60  ;;  %v547_v58 = vld [vmem:[#allocation2 + $0xa30] sm:$0xff]  ;;  %v562_v60 = vld [vmem:[#allocation2 + $0xaa8] sm:$0xff] }
  0xd4   : > { %1900 = vmatprep.subr.mxu1 %v529_v61  ;;  %1866 = vmatpush3.msra.mxu0 %v481_v62  ;;  %v579_v59 = vld [vmem:[#allocation2 + $0xb30] sm:$0xff]  ;;  %v594_v61 = vld [vmem:[#allocation2 + $0xba8] sm:$0xff] }
  0xd5   : > { %1901 = vmatpush3.msra.mxu1 %v513_v63  ;;  %1867 = vmatprep.subr.mxu0 %v496_v0  ;;  %v546_v62 = vld [vmem:[#allocation2 + $0xa28] sm:$0xff]  ;;  %v561_v0 = vld [vmem:[#allocation2 + $0xaa0] sm:$0xff] }
  0xd6   : > { %1902 = vmatprep.subr.mxu1 %v528_v1  ;;  %1868 = vmatpush3.msra.mxu0 %v480_v2  ;;  %v578_v63 = vld [vmem:[#allocation2 + $0xb28] sm:$0xff]  ;;  %v593_v1 = vld [vmem:[#allocation2 + $0xba0] sm:$0xff] }
  0xd7   : > { %1903 = vmatpush3.msra.mxu1 %v512_v3  ;;  %1869 = vmatprep.subr.mxu0 %v495_v4  ;;  %v545_v2 = vld [vmem:[#allocation2 + $0xa20] sm:$0xff]  ;;  %v560_v4 = vld [vmem:[#allocation2 + $0xa98] sm:$0xff] }
  0xd8   : > { %1904 = vmatprep.subr.mxu1 %v527_v5  ;;  %1870 = vmatpush3.msra.mxu0 %v479_v6  ;;  %v577_v3 = vld [vmem:[#allocation2 + $0xb20] sm:$0xff]  ;;  %v592_v5 = vld [vmem:[#allocation2 + $0xb98] sm:$0xff] }
  0xd9   : > { %1905 = vmatpush3.msra.mxu1 %v511_v7  ;;  %1871 = vmatprep.subr.mxu0 %v494_v8  ;;  %v544_v6 = vld [vmem:[#allocation2 + $0xa18] sm:$0xff]  ;;  %v559_v8 = vld [vmem:[#allocation2 + $0xa90] sm:$0xff] }
  0xda   : > { %1906 = vmatprep.subr.mxu1 %v526_v9  ;;  %1872 = vmatpush3.msra.mxu0 %v478_v10  ;;  %v576_v7 = vld [vmem:[#allocation2 + $0xb18] sm:$0xff]  ;;  %v591_v9 = vld [vmem:[#allocation2 + $0xb90] sm:$0xff] }
  0xdb   : > { %1907 = vmatpush3.msra.mxu1 %v510_v11  ;;  %1873 = vmatprep.subr.mxu0 %v493_v12  ;;  %v543_v10 = vld [vmem:[#allocation2 + $0xa10] sm:$0xff]  ;;  %v558_v12 = vld [vmem:[#allocation2 + $0xa88] sm:$0xff] }
  0xdc   : > { %1908 = vmatprep.subr.mxu1 %v525_v13  ;;  %1874 = vmatpush3.msra.mxu0 %v477_v14  ;;  %v575_v11 = vld [vmem:[#allocation2 + $0xb10] sm:$0xff]  ;;  %v590_v13 = vld [vmem:[#allocation2 + $0xb88] sm:$0xff] }
  0xdd   : > { %1236 = vmatprep.mubr.f32.mxu0 %v214_v15  ;;  %1909 = vmatpush3.msra.mxu1 %v509_v16  ;;  %v542_v14 = vld [vmem:[#allocation2 + $0xa08] sm:$0xff]  ;;  %v557_v16 = vld [vmem:[#allocation2 + $0xa80] sm:$0xff] }
  0xde   : > { %1237 = vmatmul.mubr.f32.vlgmr.msra.gmra.mxu0 %v213_v17  ;;  %1306 = vmatprep.mubr.f32.mxu1 %v216_v18  ;;  %v574_v15 = vld [vmem:[#allocation2 + $0xb08] sm:$0xff]  ;;  %v589_v17 = vld [vmem:[#allocation2 + $0xb80] sm:$0xff] }
  0xdf   : > { %1913 = vmatprep.subr.mxu0 %v572_v19  ;;  %1948 = vmatprep.subr.mxu1 %v604_v20  ;;  %v541_v18 = vld [vmem:[#allocation2 + $0xa00] sm:$0xff]  ;;  %v218_v19 = vld [vmem:[%s2292_s25 + $0xa8] sm:$0xff] }
  0xe0   : > { %1307 = vmatmul.mubr.f32.vlgmr.msra.gmra.mxu1 %v215_v21  ;;  %1914 = vmatpush3.msra.mxu0 %v556_v22  ;;  %v573_v20 = vld [vmem:[#allocation2 + $0xb00] sm:$0xff]  ;;  %v220_v21 = vld [vmem:[%s2292_s25 + $0xb8] sm:$0xff] }
  0xe1   : > { %1949 = vmatpush3.msra.mxu1 %v588_v23  ;;  %1915 = vmatprep.subr.mxu0 %v571_v24  ;;  %v217_v22 = vld [vmem:[%s2292_s25 + $0xa0] sm:$0xff]  ;;  %v219_v23 = vld [vmem:[%s2292_s25 + $0xb0] sm:$0xff] }
  0xe2   : > { %1950 = vmatprep.subr.mxu1 %v603_v25  ;;  %1916 = vmatpush3.msra.mxu0 %v555_v26 }
  0xe3   : > { %1951 = vmatpush3.msra.mxu1 %v587_v27  ;;  %1917 = vmatprep.subr.mxu0 %v570_v28 }
  0xe4   : > { %1952 = vmatprep.subr.mxu1 %v602_v29  ;;  %1918 = vmatpush3.msra.mxu0 %v554_v30  ;;  %v1558_v29 = vld [vmem:[#allocation5] ss:$0 sm:$0xff] }
  0xe5   : > { %1953 = vmatpush3.msra.mxu1 %v586_v31  ;;  %1919 = vmatprep.subr.mxu0 %v569_v32 }
  0xe6   : > { %1954 = vmatprep.subr.mxu1 %v601_v33  ;;  %1920 = vmatpush3.msra.mxu0 %v553_v34 }
  0xe7   : > { %1955 = vmatpush3.msra.mxu1 %v585_v35  ;;  %1921 = vmatprep.subr.mxu0 %v568_v36 }
  0xe8   : > { %1956 = vmatprep.subr.mxu1 %v600_v37  ;;  %1922 = vmatpush3.msra.mxu0 %v552_v38 }
  0xe9   : > { %1957 = vmatpush3.msra.mxu1 %v584_v39  ;;  %1923 = vmatprep.subr.mxu0 %v567_v40 }
  0xea   : > { %1958 = vmatprep.subr.mxu1 %v599_v41  ;;  %1924 = vmatpush3.msra.mxu0 %v551_v42 }
  0xeb   : > { %1959 = vmatpush3.msra.mxu1 %v583_v43  ;;  %1925 = vmatprep.subr.mxu0 %v566_v44 }
  0xec   : > { %1960 = vmatprep.subr.mxu1 %v598_v45  ;;  %1926 = vmatpush3.msra.mxu0 %v550_v46 }
  0xed   : > { %1961 = vmatpush3.msra.mxu1 %v582_v47  ;;  %1927 = vmatprep.subr.mxu0 %v565_v48 }
  0xee   : > { %1962 = vmatprep.subr.mxu1 %v597_v49  ;;  %1928 = vmatpush3.msra.mxu0 %v549_v50 }
  0xef   : > { %1963 = vmatpush3.msra.mxu1 %v581_v51  ;;  %1929 = vmatprep.subr.mxu0 %v564_v52 }
  0xf0   : > { %1964 = vmatprep.subr.mxu1 %v596_v53  ;;  %1930 = vmatpush3.msra.mxu0 %v548_v54 }
  0xf1   : > { %1965 = vmatpush3.msra.mxu1 %v580_v55  ;;  %1931 = vmatprep.subr.mxu0 %v563_v56 }
  0xf2   : > { %1966 = vmatprep.subr.mxu1 %v595_v57  ;;  %1932 = vmatpush3.msra.mxu0 %v547_v58 }
  0xf3   : > { %1967 = vmatpush3.msra.mxu1 %v579_v59  ;;  %1933 = vmatprep.subr.mxu0 %v562_v60 }
  0xf4   : > { %1968 = vmatprep.subr.mxu1 %v594_v61  ;;  %1934 = vmatpush3.msra.mxu0 %v546_v62 }
  0xf5   : > { %1969 = vmatpush3.msra.mxu1 %v578_v63  ;;  %1935 = vmatprep.subr.mxu0 %v561_v0 }
  0xf6   : > { %1970 = vmatprep.subr.mxu1 %v593_v1  ;;  %1936 = vmatpush3.msra.mxu0 %v545_v2 }
  0xf7   : > { %1971 = vmatpush3.msra.mxu1 %v577_v3  ;;  %1937 = vmatprep.subr.mxu0 %v560_v4 }
  0xf8   : > { %1972 = vmatprep.subr.mxu1 %v592_v5  ;;  %1938 = vmatpush3.msra.mxu0 %v544_v6 }
  0xf9   : > { %1973 = vmatpush3.msra.mxu1 %v576_v7  ;;  %1939 = vmatprep.subr.mxu0 %v559_v8 }
  0xfa   : > { %1974 = vmatprep.subr.mxu1 %v591_v9  ;;  %1940 = vmatpush3.msra.mxu0 %v543_v10 }
  0xfb   : > { %1975 = vmatpush3.msra.mxu1 %v575_v11  ;;  %1941 = vmatprep.subr.mxu0 %v558_v12 }
  0xfc   : > { %1976 = vmatprep.subr.mxu1 %v590_v13  ;;  %1942 = vmatpush3.msra.mxu0 %v542_v14 }
  0xfd   : > { %1977 = vmatpush3.msra.mxu1 %v574_v15  ;;  %1943 = vmatprep.subr.mxu0 %v557_v16 }
  0xfe   : > { %1978 = vmatprep.subr.mxu1 %v589_v17  ;;  %1944 = vmatpush3.msra.mxu0 %v541_v18 }
  0xff   : > { %1376 = vmatprep.mubr.f32.mxu0 %v218_v19  ;;  %1979 = vmatpush3.msra.mxu1 %v573_v20 }
 0x100   : > { %1446 = vmatprep.mubr.f32.mxu1 %v220_v21  ;;  %1377 = vmatmul.mubr.f32.vlgmr.msra.gmra.mxu0 %v217_v22 }
 0x101   : > { %1447 = vmatmul.mubr.f32.vlgmr.msra.gmra.mxu1 %v219_v23 }
 0x116   : > { %v1595_v24 = vpop.f32.mrf.mxu0 }
 0x118   : > { %v1630_v25 = vpop.f32.mrf.mxu1  ;;  %v1596_v26 = vpop.f32.mrf.mxu0 }
 0x119   : > { %v1597_v28 = vadd.f32 %v1596_v26, %v1595_v24 }
 0x11a   : > { %v1631_v30 = vpop.f32.mrf.mxu1 }
 0x11b   : > { %v679_v33 = vadd.f32 %v1597_v28, %v1558_v29  ;;  %v1632_v34 = vadd.f32 %v1631_v30, %v1630_v25 }
 0x11d   : > { %v749_v38 = vadd.f32 %v1632_v34, %v679_v33 }
 0x138   : > { %v1665_v27 = vpop.f32.mrf.mxu0 }
 0x13a   : > { %v1700_v31 = vpop.f32.mrf.mxu1  ;;  %v1666_v32 = vpop.f32.mrf.mxu0 }
 0x13b   : > { %v1667_v36 = vadd.f32 %v1666_v32, %v1665_v27 }
 0x13c   : > { %v1701_v37 = vpop.f32.mrf.mxu1 }
 0x13d   : > { %v819_v41 = vadd.f32 %v1667_v36, %v749_v38  ;;  %v1702_v42 = vadd.f32 %v1701_v37, %v1700_v31 }
 0x13f   : > { %v889_v46 = vadd.f32 %v1702_v42, %v819_v41 }
 0x15a   : > { %v1735_v35 = vpop.f32.mrf.mxu0 }
 0x15c   : > { %v1770_v39 = vpop.f32.mrf.mxu1  ;;  %v1736_v40 = vpop.f32.mrf.mxu0 }
 0x15d   : > { %v1737_v44 = vadd.f32 %v1736_v40, %v1735_v35 }
 0x15e   : > { %v1771_v45 = vpop.f32.mrf.mxu1 }
 0x15f   : > { %v959_v49 = vadd.f32 %v1737_v44, %v889_v46  ;;  %v1772_v50 = vadd.f32 %v1771_v45, %v1770_v39 }
 0x161   : > { %v1029_v54 = vadd.f32 %v1772_v50, %v959_v49 }
 0x17c   : > { %v1805_v43 = vpop.f32.mrf.mxu0 }
 0x17e   : > { %v1840_v47 = vpop.f32.mrf.mxu1  ;;  %v1806_v48 = vpop.f32.mrf.mxu0 }
 0x17f   : > { %v1807_v52 = vadd.f32 %v1806_v48, %v1805_v43 }
 0x180   : > { %v1841_v53 = vpop.f32.mrf.mxu1 }
 0x181   : > { %v1099_v57 = vadd.f32 %v1807_v52, %v1029_v54  ;;  %v1842_v58 = vadd.f32 %v1841_v53, %v1840_v47 }
 0x183   : > { %v1169_v61 = vadd.f32 %v1842_v58, %v1099_v57 }
 0x19e   : > { %v1875_v51 = vpop.f32.mrf.mxu0 }
 0x1a0   : > { %v1910_v55 = vpop.f32.mrf.mxu1  ;;  %v1876_v56 = vpop.f32.mrf.mxu0 }
 0x1a1   : > { %v1877_v59 = vadd.f32 %v1876_v56, %v1875_v51 }
 0x1a2   : > { %v1911_v60 = vpop.f32.mrf.mxu1 }
 0x1a3   : > { %v1239_v62 = vadd.f32 %v1877_v59, %v1169_v61  ;;  %v1912_v63 = vadd.f32 %v1911_v60, %v1910_v55 }
 0x1a5   : > { %v1309_v4 = vadd.f32 %v1912_v63, %v1239_v62 }
 0x1c0   : > { %v1945_v0 = vpop.f32.mrf.mxu0 }
 0x1c1   : > { %v1980_v1 = vpop.f32.mrf.mxu1 }
 0x1c2   : > { %v1946_v2 = vpop.f32.mrf.mxu0 }
 0x1c3   : > { %v1981_v3 = vpop.f32.mrf.mxu1  ;;  %v1947_v5 = vadd.f32 %v1946_v2, %v1945_v0 }
 0x1c4   : > { %v1982_v7 = vadd.f32 %v1981_v3, %v1980_v1 }
 0x1c5   : > { %v1379_v6 = vadd.f32 %v1947_v5, %v1309_v4 }
 0x1c7   : > { %v1449_v8 = vadd.f32 %v1982_v7, %v1379_v6 }
 0x1c9   : > { %1452 = vst [vmem:[%s191_s29] sm:$0xff] %v1449_v8 }
 0x1ca   : > { %2111 = shalt.err (!%p2108_p4)
}
 0x1cb   : > { %s2112_s11 = scalar_lea.hbm %s1465_s6, 128  ;;  %s2116_s20 = scalar_lea.hbm %s2355_s3, 256 }
 0x1cc   : > { %p2113_p7 = scmp.ne.s32.totalorder %s1465_s6, %s2112_s11  ;;  %p2117_p9 = scmp.lt.s32.totalorder %s1465_s6, %s2355_s3 }
 0x1cd   : > { %p2118_p10 = scmp.lt.s32.totalorder %s2116_s20, %s2112_s11 }
 0x1ce   : > { %p2114_p13 = pnand %p2113_p7, %p2231_p5 }
 0x1cf   : > { %p2119_p12 = por %p2118_p10, %p2117_p9 }
 0x1d0   : > { %p2115_p8 = pneg %p2114_p13 }
 0x1d2   : > { %p2120_p11 = pnand %p2119_p12, %p2115_p8 }
 0x1d4   : > { %2123 = shalt.err (!%p2120_p11)
}
 0x1d5   : > { %1992 = dma.vmem_to_hbm [thread:$0]  (%p2231_p5), %s1468_s30, 128, %s1465_s6, %s1454_s7  }
 0x1d6 PF: > { %p2009_p0 = scmp.ge.s32.totalorder %s2166_s15, 2  ;;  %s1479_s26 = sand.u32 1, %s2154_s12  }
 0x1d7   : > { %s1480_s27 = scalar_lea.sflag [#allocation4], %s1479_s26 }
 0x1d8   : > { %p2002_p1 = pnand %p2009_p0, %p2235_p6 }
 0x1da   : > { %p2003_p3 = pneg %p2002_p1 }
 0x1dc   : > { %2149 = dma.done.wait (%p2003_p3), %s1480_s27, 128  }
 0x1dd   : > { %2151 = vsyncadd (%p2003_p3), %s1480_s27, 4294967168  ;;  %p15_p2 = scmp.ge.s32.totalorder %s2218_s18, 4   ;;  %s2365_s12 = smov %s2158_s13 }
 0x1de   : > { %s2366_s13 = smov %s2162_s14  ;;  %s2367_s14 = smov %s2229_s21 }
 0x1df   : > { %s2368_s15 = smov %s2218_s18  ;;  %17 = sbr.rel (!%p15_p2) target bundleno = 5 (0x5), region = 76 }
 0x1e4   :  { %1485 = vsyncpa [#allocation3], 1 }
 0x1e5   :  { %1487 = vsyncpa [#allocation3 + $0x1], 1 }
 0x1e6   :  { %1488 = vsyncpa [#allocation6], 1 }
 0x1e7   :  { %1489 = vsyncpa [#allocation4], 1 }
 0x1e8   :  { %1491 = vsyncpa [#allocation4 + $0x1], 1 }

</bundles_post_ra>
